<compile_context>
chip_gen: v5e
topology: v5e:2x2
jax: 0.10.0
libtpu: 0.0.40
codegen_flags: <defaults>
</compile_context>

<pallas_src>
import functools

import numpy as np
import jax
import jax.numpy as jnp
from jax.experimental import pallas as pl
from jax.experimental.pallas import tpu as pltpu

EPS = 1e-3
K1D = np.array([0.05, 0.25, 0.4, 0.25, 0.05], dtype=np.float32)


def _replicate_conv_matrix(n: int, k1d: np.ndarray) -> np.ndarray:
    """1D conv with replicate padding as an n x n matrix: out = A @ in."""
    r = len(k1d) // 2
    A = np.zeros((n, n), dtype=np.float64)
    for i in range(n):
        for t in range(-r, r + 1):
            j = min(max(i + t, 0), n - 1)
            A[i, j] += float(k1d[t + r])
    return A


def _laplacian_operators(h: int, w: int):
    """Dense operators such that lap(p) = p - L_H @ p @ L_W (mask folded in)."""
    a_h = _replicate_conv_matrix(h, K1D)
    a_w = _replicate_conv_matrix(w, K1D)
    d_h = np.zeros(h, dtype=np.float64)
    d_h[::2] = 2.0
    d_w = np.zeros(w, dtype=np.float64)
    d_w[::2] = 2.0
    l_h = a_h @ np.diag(d_h) @ a_h          # left (row) operator
    l_w = a_w.T @ np.diag(d_w) @ a_w.T      # right (col) operator
    return l_h.astype(np.float32), l_w.astype(np.float32)


def _edge_loss_kernel(lhb_ref, lw_ref, x_ref, y_ref, out_ref, *, use_bf16):
    p, h, w = x_ref.shape
    d = x_ref[...] - y_ref[...]                       # (P, H, W) f32
    d2 = d.reshape(p * h, w)                          # layout-free when H % 8 == 0

    a = d2.astype(jnp.bfloat16) if use_bf16 else d2
    # Right multiply, batched over all planes of the chunk (one matmul, M = P*H).
    t2 = jnp.dot(a, lw_ref[...], preferred_element_type=jnp.float32)      # (P*H, W)
    t2 = t2.astype(jnp.bfloat16) if use_bf16 else t2
    # Left multiply for every plane at once via block-diagonal kron(I_P, L_H)
    # (adding exact zeros, so numerically identical to per-plane L_H @ t_p).
    s2 = jnp.dot(lhb_ref[...], t2, preferred_element_type=jnp.float32)    # (P*H, W)

    r = d2 - s2                                       # lap(x) - lap(y), stacked planes
    charb = jnp.sqrt(r * r + EPS * EPS)
    partial = jnp.sum(charb, axis=1, keepdims=True)   # lane reduce (XLU slack)
    partial = jnp.sum(partial, axis=0, keepdims=True) # sublane reduce -> (1, 1)
    out_ref[...] = partial.reshape(1, 1, 1)           # scalar per chunk; no H*W writeback


@functools.lru_cache(maxsize=None)
def _vmem_capacity_bytes() -> int:
    try:
        return int(pltpu.get_tpu_info().vmem_capacity_bytes)
    except Exception:
        return 64 << 20     # conservative fallback: assume the smallest (v7x per-TC)


def _plan_blocks(n_planes: int, h: int, w: int, vmem_cap: int):
    """Pick planes-per-chunk; returns (planes, n_chunks, pad_planes)."""
    small_part = vmem_cap <= (64 << 20)              # v7x-class (64 MiB per TC)
    in_budget = (14 << 20) if small_part else (28 << 20)   # v5e/v6e: 128 MiB parts
    per_plane = 2 * 2 * h * w * 4                    # x+y blocks, double buffered, f32
    planes = max(1, in_budget // per_plane)
    planes = min(planes, max(1, 512 // max(h, 1)))   # bound kron(I_P,L_H) size / FLOP waste
    planes = min(planes, 64)
    if n_planes >= 2:
        planes = min(planes, (n_planes + 1) // 2)    # >= 2 chunks so both v7x TCs get work
    planes = int(max(1, planes))
    n_chunks = -(-n_planes // planes)                # ceil (non-divisors handled by padding)
    pad = n_chunks * planes - n_planes
    return planes, n_chunks, pad


def _vmem_limit(planes: int, h: int, w: int, vmem_cap: int):
    ph = planes * h
    need = 4 * (2 * (ph * ph + w * w)        # resident operators (double buffered)
                + 2 * 2 * planes * h * w     # x, y blocks (double buffered)
                + 6 * planes * h * w         # d / t / s / r / charbonnier temporaries
                + 2)                         # scalar output blocks
    if need <= (12 << 20):
        return None                          # keep the default scoped-VMEM path
    cap = (44 << 20) if vmem_cap <= (64 << 20) else (96 << 20)
    return int(min(max(2 * need, 16 << 20), cap))


@functools.partial(jax.jit, static_argnames=("use_bf16",))
def edge_loss(x, y, use_bf16=False):
    """x, y: (B, 3, H, W) -> scalar Charbonnier loss of Laplacian pyramids."""
    B, C, H, W = x.shape
    assert C == 3, "EdgeLoss hardcodes 3 channels (kernel.repeat(3,1,1,1))"
    n_planes = B * C
    xp = x.reshape(n_planes, H, W).astype(jnp.float32)
    yp = y.reshape(n_planes, H, W).astype(jnp.float32)

    vmem_cap = _vmem_capacity_bytes()
    planes, n_chunks, pad = _plan_blocks(n_planes, H, W, vmem_cap)
    if pad:
        xp = jnp.pad(xp, ((0, pad), (0, 0), (0, 0)))
        yp = jnp.pad(yp, ((0, pad), (0, 0), (0, 0)))

    l_h_np, l_w_np = _laplacian_operators(H, W)
    l_hb_np = np.kron(np.eye(planes, dtype=np.float32), l_h_np)   # (P*H, P*H)
    op_dtype = jnp.bfloat16 if use_bf16 else jnp.float32
    l_hb = jnp.asarray(l_hb_np, dtype=op_dtype)
    l_w = jnp.asarray(l_w_np, dtype=op_dtype)

    kernel = functools.partial(_edge_loss_kernel, use_bf16=use_bf16)

    partials = pl.pallas_call(
        kernel,
        out_shape=jax.ShapeDtypeStruct((n_chunks, 1, 1), jnp.float32),
        grid_spec=pltpu.PrefetchScalarGridSpec(
            num_scalar_prefetch=0,
            grid=(n_chunks,),
            in_specs=[
                pl.BlockSpec((planes * H, planes * H), lambda c: (0, 0)),  # kron(I_P, L_H), resident
                pl.BlockSpec((W, W), lambda c: (0, 0)),                    # L_W, resident
                pl.BlockSpec((planes, H, W), lambda c: (c, 0, 0)),         # x chunk
                pl.BlockSpec((planes, H, W), lambda c: (c, 0, 0)),         # y chunk
            ],
            out_specs=pl.BlockSpec((1, 1, 1), lambda c: (c, 0, 0)),        # scalar partial
        ),
        compiler_params=pltpu.CompilerParams(
            dimension_semantics=("parallel",),          # chunks independent -> 2 TCs on v7x
            vmem_limit_bytes=_vmem_limit(planes, H, W, vmem_cap),
        ),
    )(l_hb, l_w, xp, yp)

    total = jnp.sum(partials)
    if pad:
        # Zero-padded planes contribute exactly sqrt(eps^2) per element.
        pad_elem = float(np.sqrt(np.float32(EPS * EPS)))
        total = total - jnp.float32(pad * H * W * pad_elem)
    return total / jnp.float32(n_planes * H * W)


def _edge_loss_ref(x, y):
    """Pure NumPy float64 reference of the original PyTorch EdgeLoss pipeline."""
    x = np.asarray(x, dtype=np.float64)
    y = np.asarray(y, dtype=np.float64)
    B, C, H, W = x.shape
    a_h = _replicate_conv_matrix(H, K1D)
    a_w = _replicate_conv_matrix(W, K1D)

    def gauss(p):
        return a_h @ p @ a_w.T

    def lap(p):
        f = gauss(p)
        nf = np.zeros_like(f)
        nf[::2, ::2] = 4.0 * f[::2, ::2]
        return p - gauss(nf)

    total = 0.0
    for b in range(B):
        for c in range(C):
            d = lap(x[b, c]) - lap(y[b, c])
            total += float(np.sum(np.sqrt(d * d + EPS * EPS)))
    return total / (B * C * H * W)


if __name__ == "__main__":
    key = jax.random.PRNGKey(0)
    kx, ky = jax.random.split(key)

    # Main check: B=2, C=3, H=W=16 -> 6 planes, 3 planes/chunk, 2 chunks.
    B, C, H, W = 2, 3, 16, 16
    x = jax.random.uniform(kx, (B, C, H, W), dtype=jnp.float32)
    y = jax.random.uniform(ky, (B, C, H, W), dtype=jnp.float32)
    loss = edge_loss(x, y)
    jax.block_until_ready(loss)
    ref = _edge_loss_ref(np.asarray(x), np.asarray(y))
    assert np.isclose(float(loss), ref, rtol=1e-3, atol=1e-5), (float(loss), ref)

    # Also exercise the zero-padded (non-divisor) path: 3 planes -> 2 chunks + 1 pad plane.
    x1, y1 = x[:1], y[:1]
    loss1 = edge_loss(x1, y1)
    jax.block_until_ready(loss1)
    ref1 = _edge_loss_ref(np.asarray(x1), np.asarray(y1))
    assert np.isclose(float(loss1), ref1, rtol=1e-3, atol=1e-5), (float(loss1), ref1)

    print("KERNEL_OK")
</pallas_src>

<mosaic_0001>
module attributes {stable_mosaic.version = 11 : i64} {
  func.func @_edge_loss_kernel(%arg0: i32, %arg1: memref<48x48xf32, #tpu.memory_space<vmem>>, %arg2: memref<16x16xf32, #tpu.memory_space<vmem>>, %arg3: memref<3x16x16xf32, #tpu.memory_space<vmem>>, %arg4: memref<3x16x16xf32, #tpu.memory_space<vmem>>, %arg5: memref<1x1x1xf32, #tpu.memory_space<vmem>>) attributes {dimension_semantics = [#tpu.dimension_semantics<parallel>], iteration_bounds = array<i64: 2>, scalar_prefetch = 0 : i64, scratch_operands = 0 : i64, tpu.core_type = #tpu.core_type<tc>, window_params = [{pipeline_mode = #tpu.pipeline_mode<synchronous>, transform_indices = @transform_0, window_bounds = array<i64: 48, 48>}, {pipeline_mode = #tpu.pipeline_mode<synchronous>, transform_indices = @transform_1, window_bounds = array<i64: 16, 16>}, {transform_indices = @transform_2, window_bounds = array<i64: 3, 16, 16>}, {transform_indices = @transform_3, window_bounds = array<i64: 3, 16, 16>}, {transform_indices = @transform_4, window_bounds = array<i64: 1, 1, 1>}]} {
    %c0 = arith.constant 0 : index
    %c0_0 = arith.constant 0 : index
    %c0_1 = arith.constant 0 : index
    %0 = vector.load %arg3[%c0, %c0_0, %c0_1] : memref<3x16x16xf32, #tpu.memory_space<vmem>>, vector<3x16x16xf32>
    %c0_2 = arith.constant 0 : index
    %c0_3 = arith.constant 0 : index
    %c0_4 = arith.constant 0 : index
    %1 = vector.load %arg4[%c0_2, %c0_3, %c0_4] : memref<3x16x16xf32, #tpu.memory_space<vmem>>, vector<3x16x16xf32>
    %2 = arith.subf %0, %1 : vector<3x16x16xf32>
    %3 = vector.shape_cast %2 : vector<3x16x16xf32> to vector<48x16xf32>
    %c0_5 = arith.constant 0 : index
    %c0_6 = arith.constant 0 : index
    %4 = vector.load %arg2[%c0_5, %c0_6] : memref<16x16xf32, #tpu.memory_space<vmem>>, vector<16x16xf32>
    %cst = arith.constant dense<0.000000e+00> : vector<48x16xf32>
    %5 = tpu.matmul %3, %4, %cst {dimension_numbers = #tpu.dot_dimension_numbers<[1], [0], [0], [1], [0, 0, 1, 1], [], []>} : vector<48x16xf32>, vector<16x16xf32>, vector<48x16xf32> -> vector<48x16xf32>
    %c0_7 = arith.constant 0 : index
    %c0_8 = arith.constant 0 : index
    %6 = vector.load %arg1[%c0_7, %c0_8] : memref<48x48xf32, #tpu.memory_space<vmem>>, vector<48x48xf32>
    %cst_9 = arith.constant dense<0.000000e+00> : vector<48x16xf32>
    %7 = tpu.matmul %6, %5, %cst_9 {dimension_numbers = #tpu.dot_dimension_numbers<[1], [0], [0], [1], [0, 0, 1, 1], [], []>} : vector<48x48xf32>, vector<48x16xf32>, vector<48x16xf32> -> vector<48x16xf32>
    %8 = arith.subf %3, %7 : vector<48x16xf32>
    %9 = arith.mulf %8, %8 : vector<48x16xf32>
    %cst_10 = arith.constant 9.99999997E-7 : f32
    %10 = vector.broadcast %cst_10 : f32 to vector<48x16xf32>
    %11 = arith.addf %9, %10 : vector<48x16xf32>
    %12 = math.sqrt %11 : vector<48x16xf32>
    %cst_11 = arith.constant dense<0.000000e+00> : vector<48xf32>
    %13 = vector.multi_reduction <add>, %12, %cst_11 [1] : vector<48x16xf32> to vector<48xf32>
    %14 = vector.shape_cast %13 : vector<48xf32> to vector<48x1xf32>
    %cst_12 = arith.constant dense<0.000000e+00> : vector<1xf32>
    %15 = vector.multi_reduction <add>, %14, %cst_12 [0] : vector<48x1xf32> to vector<1xf32>
    %16 = vector.shape_cast %15 : vector<1xf32> to vector<1x1xf32>
    %17 = vector.shape_cast %16 : vector<1x1xf32> to vector<1x1x1xf32>
    %c0_13 = arith.constant 0 : index
    %c0_14 = arith.constant 0 : index
    %c0_15 = arith.constant 0 : index
    %18 = vector.load %arg5[%c0_13, %c0_14, %c0_15] : memref<1x1x1xf32, #tpu.memory_space<vmem>>, vector<1x1x1xf32>
    tpu.vector_store %arg5[%c0_13, %c0_14, %c0_15], %17 {strides = array<i32>} : memref<1x1x1xf32, #tpu.memory_space<vmem>>, vector<1x1x1xf32>,
    return
  }
  func.func @transform_0(%arg0: i32) -> (i32, i32) {
    %c0_i32 = arith.constant 0 : i32
    %c0_i32_0 = arith.constant 0 : i32
    %c0_i32_1 = arith.constant 0 : i32
    return %c0_i32, %c0_i32_0 : i32, i32
  }
  func.func @transform_1(%arg0: i32) -> (i32, i32) {
    %c0_i32 = arith.constant 0 : i32
    %c0_i32_0 = arith.constant 0 : i32
    %c0_i32_1 = arith.constant 0 : i32
    return %c0_i32, %c0_i32_0 : i32, i32
  }
  func.func @transform_2(%arg0: i32) -> (i32, i32, i32) {
    %c0_i32 = arith.constant 0 : i32
    %c0_i32_0 = arith.constant 0 : i32
    %c0_i32_1 = arith.constant 0 : i32
    return %arg0, %c0_i32, %c0_i32_0 : i32, i32, i32
  }
  func.func @transform_3(%arg0: i32) -> (i32, i32, i32) {
    %c0_i32 = arith.constant 0 : i32
    %c0_i32_0 = arith.constant 0 : i32
    %c0_i32_1 = arith.constant 0 : i32
    return %arg0, %c0_i32, %c0_i32_0 : i32, i32, i32
  }
  func.func @transform_4(%arg0: i32) -> (i32, i32, i32) {
    %c0_i32 = arith.constant 0 : i32
    %c0_i32_0 = arith.constant 0 : i32
    %c0_i32_1 = arith.constant 0 : i32
    return %arg0, %c0_i32, %c0_i32_0 : i32, i32, i32
  }
}

</mosaic_0001>

<bundles_post_ra>
// kernel: edge_loss.1
= control target key start
LH: loop header
LB: loop body
LE: loop exit
PB: predicated region body
PF: predicated region fallthrough
CT: control target
= control target key end

     0   :  { %9 = vsyncpa [#allocation3], 0  ;;  %s1179_s0 = inlined_call_operand.hbm [shape: f32[48,48], index: 0, kind: input, shape index: {}]   ;;  %s1180_s1 = inlined_call_operand.hbm [shape: f32[16,16], index: 1, kind: input, shape index: {}]   ;;  %s1181_s2 = inlined_call_operand.hbm [shape: f32[6,16,16], index: 2, kind: input, shape index: {}]   ;;  %s1182_s3 = inlined_call_operand.hbm [shape: f32[6,16,16], index: 3, kind: input, shape index: {}]   ;;  %s1183_s4 = inlined_call_operand.vmem [shape: f32[2,1,1], index: 4, kind: output, shape index: {}]  }
   0x1   :  { %10 = vsyncpa [#allocation5], 0  ;;  %s958_s15 = smov 0   ;;  %s960_s16 = smov 0  }
   0x2   :  { %s962_s17 = smov 0   ;;  %s964_s18 = smov 0  }
   0x3 LB: > { %s977_s19 = sadd.s32 4294967295, %s927_s18   ;;  %p78_p0 = scmp.ne.s32.totalorder %s919_s16, %s915_s15  ;;  %s927_s18 = sphi %s964_s18, %s1194_s18   ;;  %s923_s17 = sphi %s962_s17, %s1193_s17   ;;  %s919_s16 = sphi %s960_s16, %s1192_s16   ;;  %s915_s15 = sphi %s958_s15, %s1191_s15  }
   0x4   : > { %p79_p1 = scmp.eq.s32.totalorder %s977_s19, 0  ;;  %p644_p2 = scmp.ge.s32.totalorder %s927_s18, 1 }
   0x5   : > { %p141_p3 = scmp.lt.s32.totalorder %s927_s18, 3  ;;  %s152_s23 = sshll.u32 %s1179_s0, 4  ;;  %s153_s23 = int_to_ptr.hbm [resolvable:$true] %s152_s23 }
   0x6   : > { %p985_p4 = por %p79_p1, %p78_p0  ;;  %s929_s25 = smov [#allocation2]  }
   0x7   : > { %p992_p5 = pnand %p644_p2, %p141_p3  ;;  %s154_s26 = sshll.u32 %s929_s25, 4  ;;  %s155_s26 = int_to_ptr.vmem [resolvable:$true] %s154_s26 }
   0x8   : > { %s1005_s28 = sadd.s32 1, %s927_s18   ;;  %s1184_s29 = smov 128  }
   0x9   : > { %p698_p6 = pneg %p992_p5  ;;  %s931_s30 = smov 8  }
   0xa   : > { %s62_s5 = ssub.s32 %s927_s18, %s1005_s28  ;;  %s65_s6 = sadd.s32 1, %s923_s17 }
   0xb   : > { %p1000_p7 = pnand %p698_p6, %p79_p1  ;;  %p63_p8 = scmp.eq.s32.totalorder %s62_s5, 0 }
   0xc   : > { %p72_p9 = scmp.ne.s32.totalorder %s923_s17, %s919_s16  ;;  %p73_p10 = scmp.eq.s32.totalorder %s927_s18, 0 }
   0xd   : > { %701 = dma.hbm_to_vmem [thread:$0]  (!%p1000_p7), %s153_s23, 768, %s155_s26, [#allocation3], %s1184_s29, %s1184_s29, %s931_s30  }
   0xe   : > { %p714_p11 = scmp.lt.s32.totalorder %s927_s18, 2  ;;  %p74_p12 = por %p73_p10, %p72_p9 }
   0xf   : > { %s1020_s7 = scalar_select %p63_p8, %s923_s17, %s65_s6  }
  0x10   : > { %s182_s8 = sand.u32 1, %s927_s18   ;;  %s184_s9 = sand.u32 1, %s923_s17  }
  0x11   : > { %s1024_s10 = smul.u32 48, %s184_s9  ;;  %p1026_p13 = pnand %p714_p11, %p74_p12 }
  0x12   : > { %s673_s12 = smul.u32 48, %s927_s18  ;;  %s166_s15 = sshll.u32 %s1180_s1, 4  ;;  %s167_s15 = int_to_ptr.hbm [resolvable:$true] %s166_s15 }
  0x13   : > { %s186_s25 = scalar_lea.vmem [#allocation6], %s1024_s10  ;;  %s1038_s6 = scalar_lea.sflag [#allocation3], %s182_s8 }
  0x14   : > { %s192_s23 = scalar_lea.hbm %s1181_s2, %s673_s12  ;;  %s195_s26 = sshll.u32 %s186_s25, 4  ;;  %s196_s26 = int_to_ptr.vmem [resolvable:$true] %s195_s26 }
  0x15   : > { %s193_s5 = sshll.u32 %s192_s23, 4  ;;  %p799_p2 = pneg %p1026_p13  ;;  %s194_s5 = int_to_ptr.hbm [resolvable:$true] %s193_s5 }
  0x16   : > { %s795_s9 = sshra.s32 %s194_s5, 4  ;;  %s802_s14 = scalar_lea.hbm %s1181_s2, 96  ;;  %s796_s9 = int_to_ptr.hbm [resolvable:$true] %s795_s9 }
  0x17   : > { %s797_s29 = scalar_lea.hbm %s796_s9, 48  ;;  %p803_p8 = scmp.lt.s32.totalorder %s796_s9, %s1181_s2 }
  0x18   : > { %p798_p0 = scmp.ne.s32.totalorder %s796_s9, %s797_s29  ;;  %p804_p9 = scmp.lt.s32.totalorder %s802_s14, %s797_s29 }
  0x1a   : > { %p800_p3 = pnand %p799_p2, %p798_p0  ;;  %p805_p10 = por %p804_p9, %p803_p8 }
  0x1c   : > { %p801_p6 = pneg %p800_p3 }
  0x1e   : > { %p806_p11 = pnand %p805_p10, %p801_p6 }
  0x20   : > { %809 = shalt.err (!%p806_p11)
}
  0x21   : > { %s1190_s8 = smov 128   ;;  %s932_s23 = smov [#allocation4]  }
  0x22   : > { %708 = dma.hbm_to_vmem [thread:$0]  (!%p1026_p13), %s194_s5, 768, %s196_s26, %s1038_s6, %s1190_s8, %s1190_s8, %s931_s30  }
  0x23   : > { %s168_s25 = sshll.u32 %s932_s23, 4  ;;  %s215_s9 = scalar_lea.hbm %s1182_s3, %s673_s12  ;;  %s169_s25 = int_to_ptr.vmem [resolvable:$true] %s168_s25 }
  0x24   : > { %s216_s29 = sshll.u32 %s215_s9, 4  ;;  %s209_s14 = scalar_lea.vmem [#allocation7], %s1024_s10  ;;  %s217_s29 = int_to_ptr.hbm [resolvable:$true] %s216_s29 }
  0x25   : > { %704 = dma.hbm_to_vmem [thread:$0]  (!%p1000_p7), %s167_s15, 256, %s169_s25, [#allocation5], %s1190_s8, %s1190_s8, %s931_s30  }
  0x26   : > { %s218_s21 = sshll.u32 %s209_s14, 4  ;;  %s855_s22 = sshra.s32 %s217_s29, 4  ;;  %s219_s21 = int_to_ptr.vmem [resolvable:$true] %s218_s21  ;;  %s856_s22 = int_to_ptr.hbm [resolvable:$true] %s855_s22 }
  0x27   : > { %s857_s26 = scalar_lea.hbm %s856_s22, 48  ;;  %s862_s27 = scalar_lea.hbm %s1182_s3, 96 }
  0x28   : > { %p858_p12 = scmp.ne.s32.totalorder %s856_s22, %s857_s26  ;;  %p863_p7 = scmp.lt.s32.totalorder %s856_s22, %s1182_s3 }
  0x29   : > { %p864_p6 = scmp.lt.s32.totalorder %s862_s27, %s857_s26 }
  0x2a   : > { %p860_p0 = pnand %p858_p12, %p799_p2 }
  0x2b   : > { %p865_p8 = por %p864_p6, %p863_p7 }
  0x2c   : > { %p861_p3 = pneg %p860_p0 }
  0x2e   : > { %p866_p9 = pnand %p865_p8, %p861_p3 }
  0x30   : > { %869 = shalt.err (!%p866_p9)
}
  0x31   : > { %711 = dma.hbm_to_vmem [thread:$0]  (!%p1026_p13), %s217_s29, 768, %s219_s21, %s1038_s6, %s1190_s8, %s1190_s8, %s931_s30  }
  0x32   : > { %230 = sbr.rel (%p992_p5) target bundleno = 538 (0x21a), region = 36 }
  0x37   : > { %902 = dma.done.wait (%p79_p1), [#allocation3], 768  }
  0x38   : > { %904 = vsyncadd (%p79_p1), [#allocation3], 4294966528 }
  0x39   : > { %906 = dma.done.wait (%p79_p1), [#allocation5], 256  }
  0x3a   : > { %908 = vsyncadd (%p79_p1), [#allocation5], 4294967040  ;;  %s242_s10 = sand.u32 1, %s977_s19   ;;  %s244_s30 = sand.u32 1, %s919_s16  }
  0x3b   : > { %s685_s11 = smul.u32 48, %s244_s30  ;;  %s243_s24 = scalar_lea.sflag [#allocation3], %s242_s10 }
  0x3d   : > { %s1093_s15 = scalar_lea.vmem [#allocation6], %s685_s11 }
  0x3e   : > { %910 = dma.done.wait (%p985_p4), %s243_s24, 1536  }
  0x3f   : > { %912 = vsyncadd (%p985_p4), %s243_s24, 4294965760  ;;  %v309_v0 = vld [vmem:[#allocation4 + $0x8] sm:$0xff]  ;;  %v308_v1 = vld [vmem:[#allocation4] sm:$0xff]  ;;  %s256_s6 = scalar_lea.vmem [#allocation7], %s685_s11  ;;  %vm310_vm0 = vcmask 130048   ;;  %vm370_vm1 = vcmask 392192  }
  0x40   : > { %v290_v2 = vld [vmem:[%s1093_s15] sm:$0xff]  ;;  %343 = vmatpush.msra.mxu0 %v309_v0  ;;  %675 = vmatpush.msra.mxu3 %v309_v0  ;;  %v291_v8 = vld [vmem:[%s1093_s15 + $0x8] sm:$0xff]  ;;  %v292_v14 = vld [vmem:[%s1093_s15 + $0x10] sm:$0xff]  ;;  %p287_p1 = scmp.lt.s32.totalorder %s977_s19, 1  ;;  %vm543_vm14 = vcmask 0  }
  0x41   : > { %v296_v3 = vld [vmem:[%s256_s6] sm:$0xff]  ;;  %v297_v9 = vld [vmem:[%s256_s6 + $0x8] sm:$0xff]  ;;  %v298_v15 = vld [vmem:[%s256_s6 + $0x10] sm:$0xff] }
  0x42   : > { %v294_v4 = vld [vmem:[%s1093_s15 + $0x20] sm:$0xff]  ;;  %v302_v6 = vsub.f32 %v290_v2, %v296_v3  ;;  %344 = vmatpush.msra.mxu0 %v308_v1  ;;  %676 = vmatpush.msra.mxu3 %v308_v1  ;;  %v295_v10 = vld [vmem:[%s1093_s15 + $0x28] sm:$0xff]  ;;  %v303_v12 = vsub.f32 %v291_v8, %v297_v9  ;;  %v304_v16 = vsub.f32 %v292_v14, %v298_v15  ;;  %v293_v17 = vld [vmem:[%s1093_s15 + $0x18] sm:$0xff]  ;;  %s1196_s19 = smov (!%p287_p1, %s977_s19), 1 }
  0x43   : > { %v300_v5 = vld [vmem:[%s256_s6 + $0x20] sm:$0xff]  ;;  %v301_v11 = vld [vmem:[%s256_s6 + $0x28] sm:$0xff]  ;;  %v299_v18 = vld [vmem:[%s256_s6 + $0x18] sm:$0xff]  ;;  %s289_s25 = scalar_lea.vmem %s1183_s4, %s1196_s19 }
  0x44   : > { %v1101_v7 = vsub.f32 %v294_v4, %v300_v5  ;;  %655 = vmatmul.msk.f32.vlgmr.msra.gmra.mxu0 %vm310_vm0, %v302_v6  ;;  %v1108_v13 = vsub.f32 %v295_v10, %v301_v11  ;;  %v305_v19 = vsub.f32 %v293_v17, %v299_v18  ;;  %v364_v26 = vld [vmem:[#allocation2] sm:$0xff]  ;;  %v367_v27 = vld [vmem:[#allocation2 + $0x18] sm:$0xff]  ;;  %v365_v28 = vld [vmem:[#allocation2 + $0x8] sm:$0xff] }
  0x45   : > { %v368_v29 = vld [vmem:[#allocation2 + $0x20] sm:$0xff]  ;;  %v366_v30 = vld [vmem:[#allocation2 + $0x10] sm:$0xff]  ;;  %v369_v31 = vld [vmem:[#allocation2 + $0x28] sm:$0xff] }
  0x46   : > { %659 = vmatmul.msk.f32.vlgmr.msra.gmra.mxu3 %vm310_vm0, %v1101_v7 }
  0x4c   : > { %656 = vmatmul.msk.f32.gmra.mxu0 %vm310_vm0, %v303_v12 }
  0x4e   : > { %660 = vmatmul.msk.f32.gmra.mxu3 %vm310_vm0, %v1108_v13 }
  0x54   : > { %657 = vmatmul.msk.f32.gmra.mxu0 %vm310_vm0, %v304_v16 }
  0x5c   : > { %658 = vmatmul.msk.f32.gmra.mxu0 %vm310_vm0, %v305_v19 }
  0xc1   : > { %v346_v20 = vpop.f32.mrf.mxu0 }
  0xc9   : > { %v358_v21 = vpop.f32.mrf.mxu3  ;;  %v349_v22 = vpop.f32.mrf.mxu0 }
  0xd1   : > { %v361_v23 = vpop.f32.mrf.mxu3  ;;  %v352_v24 = vpop.f32.mrf.mxu0 }
  0xd2   : > { %399 = vmatpush.msra.mxu1 %v361_v23  ;;  %677 = vmatpush.msra.mxu2 %v361_v23 }
  0xd4   : > { %400 = vmatpush.msra.mxu1 %v358_v21  ;;  %678 = vmatpush.msra.mxu2 %v358_v21 }
  0xd9   : > { %v355_v25 = vpop.f32.mrf.mxu0 }
  0xda   : > { %401 = vmatpush.msra.mxu1 %v355_v25  ;;  %679 = vmatpush.msra.mxu2 %v355_v25 }
  0xdc   : > { %402 = vmatpush.msra.mxu1 %v352_v24  ;;  %680 = vmatpush.msra.mxu2 %v352_v24 }
  0xde   : > { %403 = vmatpush.msra.mxu1 %v349_v22  ;;  %681 = vmatpush.msra.mxu2 %v349_v22 }
  0xe0   : > { %404 = vmatpush.msra.mxu1 %v346_v20  ;;  %682 = vmatpush.msra.mxu2 %v346_v20 }
  0xe1   : > { %661 = vmatmul.msk.f32.vlgmr.msra.gmra.mxu1 %vm370_vm1, %v364_v26  ;;  %664 = vmatmul.msk.f32.vlgmr.msra.gmra.mxu2 %vm370_vm1, %v367_v27 }
  0xe9   : > { %662 = vmatmul.msk.f32.gmra.mxu1 %vm370_vm1, %v365_v28  ;;  %665 = vmatmul.msk.f32.gmra.mxu2 %vm370_vm1, %v368_v29 }
  0xf1   : > { %663 = vmatmul.msk.f32.gmra.mxu1 %vm370_vm1, %v366_v30  ;;  %666 = vmatmul.msk.f32.gmra.mxu2 %vm370_vm1, %v369_v31 }
 0x15e   : > { %v406_v32 = vpop.f32.mrf.mxu1 }
 0x15f   : > { %v424_v33 = vsub.f32 %v302_v6, %v406_v32 }
 0x161   : > { %v430_v34 = vmul.f32 %v424_v33, %v424_v33 }
 0x163   : > { %v436_v35 = vadd.f32 1e-06, %v430_v34 }
 0x164   : > { %v415_v36 = vpop.f32.mrf.mxu2 }
 0x165   : > { %v427_v37 = vsub.f32 %v305_v19, %v415_v36  ;;  %753 = vrsqrt.f32 %v436_v35  ;;  %vm449_vm2 = vcmp.eq.f32.partialorder %v436_v35, inf  ;;  %v452_v3 = vand.u32 2147483648, %v436_v35 }
 0x166   : > { %v409_v38 = vpop.f32.mrf.mxu1  ;;  %vm451_vm3 = vcmp.eq.f32.partialorder %v436_v35, 0.0 }
 0x167   : > { %v433_v39 = vmul.f32 %v427_v37, %v427_v37  ;;  %v425_v40 = vsub.f32 %v303_v12, %v409_v38 }
 0x169   : > { %v1117_v41 = vadd.f32 1e-06, %v433_v39  ;;  %v431_v42 = vmul.f32 %v425_v40, %v425_v40 }
 0x16b   : > { %v754_v43 = vpop.eup %753  ;;  %v437_v44 = vadd.f32 1e-06, %v431_v42  ;;  %755 = vrsqrt.f32 %v1117_v41  ;;  %vm485_vm10 = vcmp.eq.f32.partialorder %v1117_v41, inf  ;;  %vm487_vm13 = vcmp.eq.f32.partialorder %v1117_v41, 0.0 }
 0x16c   : > { %v418_v45 = vpop.f32.mrf.mxu2  ;;  %v443_v46 = vmul.f32 %v754_v43, %v436_v35 }
 0x16d   : > { %v428_v47 = vsub.f32 %v1101_v7, %v418_v45  ;;  %757 = vrsqrt.f32 %v437_v44  ;;  %vm461_vm4 = vcmp.eq.f32.partialorder %v437_v44, inf  ;;  %vm463_vm5 = vcmp.eq.f32.partialorder %v437_v44, 0.0 }
 0x16e   : > { %v412_v48 = vpop.f32.mrf.mxu1  ;;  %v444_v49 = vmul.f32 %v754_v43, %v443_v46  ;;  %v464_v21 = vand.u32 2147483648, %v437_v44 }
 0x16f   : > { %v434_v50 = vmul.f32 %v428_v47, %v428_v47  ;;  %v426_v51 = vsub.f32 %v304_v16, %v412_v48 }
 0x170   : > { %v445_v52 = vmul.f32 0.5, %v444_v49 }
 0x171   : > { %v756_v53 = vpop.eup %755  ;;  %v1121_v54 = vadd.f32 1e-06, %v434_v50  ;;  %v432_v55 = vmul.f32 %v426_v51, %v426_v51 }
 0x172   : > { %v446_v56 = vsub.f32 1.5, %v445_v52  ;;  %v479_v62 = vmul.f32 %v756_v53, %v1117_v41 }
 0x173   : > { %v758_v57 = vpop.eup %757  ;;  %v1123_v58 = vadd.f32 1e-06, %v432_v55  ;;  %759 = vrsqrt.f32 %v1121_v54  ;;  %vm497_vm6 = vcmp.eq.f32.partialorder %v1121_v54, inf  ;;  %v500_v36 = vand.u32 2147483648, %v1121_v54 }
 0x174   : > { %v421_v59 = vpop.f32.mrf.mxu2  ;;  %v447_v60 = vmul.f32 %v754_v43, %v446_v56  ;;  %v455_v61 = vmul.f32 %v758_v57, %v437_v44  ;;  %v480_v6 = vmul.f32 %v756_v53, %v479_v62  ;;  %vm499_vm7 = vcmp.eq.f32.partialorder %v1121_v54, 0.0 }
 0x175   : > { %v429_v63 = vsub.f32 %v1108_v13, %v421_v59  ;;  %761 = vrsqrt.f32 %v1123_v58  ;;  %vm473_vm8 = vcmp.eq.f32.partialorder %v1123_v58, inf  ;;  %vm475_vm9 = vcmp.eq.f32.partialorder %v1123_v58, 0.0 }
 0x176   : > { %v448_v0 = vmul.f32 %v447_v60, %v436_v35  ;;  %v456_v1 = vmul.f32 %v758_v57, %v455_v61  ;;  %v481_v17 = vmul.f32 0.5, %v480_v6  ;;  %v476_v42 = vand.u32 2147483648, %v1123_v58 }
 0x177   : > { %v435_v2 = vmul.f32 %v429_v63, %v429_v63 }
 0x178   : > { %v450_v4 = vsel %vm449_vm2, %v436_v35, %v448_v0  ;;  %v457_v5 = vmul.f32 0.5, %v456_v1  ;;  %v482_v25 = vsub.f32 1.5, %v481_v17 }
 0x179   : > { %v760_v7 = vpop.eup %759  ;;  %v1129_v8 = vadd.f32 1e-06, %v435_v2  ;;  %v453_v9 = vsel %vm451_vm3, %v452_v3, %v450_v4 }
 0x17a   : > { %v514_v10 = vsel %vm310_vm0, %v453_v9, 0.0  ;;  %v458_v11 = vsub.f32 1.5, %v457_v5  ;;  %v491_v12 = vmul.f32 %v760_v7, %v1121_v54  ;;  %v483_v35 = vmul.f32 %v756_v53, %v482_v25 }
 0x17b   : > { %v762_v13 = vpop.eup %761  ;;  %515 = vadd.xlane.f32.xlu0 %v514_v10  ;;  %763 = vrsqrt.f32 %v1129_v8  ;;  %vm509_vm11 = vcmp.eq.f32.partialorder %v1129_v8, inf  ;;  %v512_v52 = vand.u32 2147483648, %v1129_v8  ;;  %v488_v53 = vand.u32 2147483648, %v1117_v41 }
 0x17c   : > { %v459_v14 = vmul.f32 %v758_v57, %v458_v11  ;;  %v492_v15 = vmul.f32 %v760_v7, %v491_v12  ;;  %v467_v16 = vmul.f32 %v762_v13, %v1123_v58  ;;  %v484_v46 = vmul.f32 %v483_v35, %v1117_v41 }
 0x17d   : > { %vm511_vm12 = vcmp.eq.f32.partialorder %v1129_v8, 0.0 }
 0x17e   : > { %v460_v18 = vmul.f32 %v459_v14, %v437_v44  ;;  %v493_v19 = vmul.f32 0.5, %v492_v15  ;;  %v468_v20 = vmul.f32 %v762_v13, %v467_v16  ;;  %v486_v51 = vsel %vm485_vm10, %v1117_v41, %v484_v46 }
 0x17f   : > { %v489_v56 = vsel %vm487_vm13, %v488_v53, %v486_v51 }
 0x180   : > { %v462_v22 = vsel %vm461_vm4, %v437_v44, %v460_v18  ;;  %v494_v23 = vsub.f32 1.5, %v493_v19  ;;  %v469_v24 = vmul.f32 0.5, %v468_v20 }
 0x181   : > { %v764_v26 = vpop.eup %763  ;;  %v465_v27 = vsel %vm463_vm5, %v464_v21, %v462_v22 }
 0x182   : > { %v517_v28 = vsel %vm310_vm0, %v465_v27, 0.0  ;;  %v495_v29 = vmul.f32 %v760_v7, %v494_v23  ;;  %v470_v30 = vsub.f32 1.5, %v469_v24  ;;  %v503_v31 = vmul.f32 %v764_v26, %v1129_v8 }
 0x183   : > { %518 = vadd.xlane.f32.xlu0 %v517_v28 }
 0x184   : > { %v496_v32 = vmul.f32 %v495_v29, %v1121_v54  ;;  %v471_v33 = vmul.f32 %v762_v13, %v470_v30  ;;  %v504_v34 = vmul.f32 %v764_v26, %v503_v31 }
 0x186   : > { %v498_v37 = vsel %vm497_vm6, %v1121_v54, %v496_v32  ;;  %v472_v38 = vmul.f32 %v471_v33, %v1123_v58  ;;  %v505_v39 = vmul.f32 0.5, %v504_v34 }
 0x187   : > { %v501_v40 = vsel %vm499_vm7, %v500_v36, %v498_v37 }
 0x188   : > { %v526_v43 = vsel %vm310_vm0, %v501_v40, 0.0  ;;  %v474_v44 = vsel %vm473_vm8, %v1123_v58, %v472_v38  ;;  %v506_v45 = vsub.f32 1.5, %v505_v39  ;;  %v523_v58 = vsel %vm310_vm0, %v489_v56, 0.0 }
 0x189   : > { %527 = vadd.xlane.f32.xlu2 %v526_v43  ;;  %v477_v47 = vsel %vm475_vm9, %v476_v42, %v474_v44 }
 0x18a   : > { %v520_v48 = vsel %vm310_vm0, %v477_v47, 0.0  ;;  %v507_v49 = vmul.f32 %v764_v26, %v506_v45 }
 0x18b   : > { %521 = vadd.xlane.f32.xlu1 %v520_v48 }
 0x18c   : > { %v508_v50 = vmul.f32 %v507_v49, %v1129_v8 }
 0x18e   : > { %v510_v54 = vsel %vm509_vm11, %v1129_v8, %v508_v50 }
 0x18f   : > { %v513_v55 = vsel %vm511_vm12, %v512_v52, %v510_v54 }
 0x190   : > { %v529_v57 = vsel %vm310_vm0, %v513_v55, 0.0 }
 0x191   : > { %530 = vadd.xlane.f32.xlu2 %v529_v57 }
 0x193   : > { %524 = vadd.xlane.f32.xlu1 %v523_v58 }
 0x1ee   : > { %v516_v59 = vpop.xlane.xlu0 %515 }
 0x1f6   : > { %v519_v61 = vpop.xlane.xlu0 %518 }
 0x1f7   : > { %v532_v63 = vadd.f32 %v519_v61, %v516_v59 }
 0x1fc   : > { %v528_v62 = vpop.xlane.xlu2 %527 }
 0x1fe   : > { %v522_v60 = vpop.xlane.xlu1 %521 }
 0x1ff   : > { %v533_v0 = vadd.f32 %v532_v63, %v522_v60 }
 0x204   : > { %v531_v41 = vpop.xlane.xlu2 %530 }
 0x206   : > { %v525_v1 = vpop.xlane.xlu1 %524 }
 0x207   : > { %v534_v2 = vadd.f32 %v533_v0, %v525_v1 }
 0x209   : > { %v535_v3 = vadd.f32 %v534_v2, %v528_v62 }
 0x20b   : > { %v536_v4 = vadd.f32 %v535_v3, %v531_v41 }
 0x20d   : > { %v537_v5 = vrot.slane %v536_v4, 4 }
 0x20f   : > { %v538_v6 = vadd.f32 %v537_v5, %v536_v4 }
 0x211   : > { %v539_v7 = vrot.slane %v538_v6, 2 }
 0x213   : > { %v540_v8 = vadd.f32 %v539_v7, %v538_v6 }
 0x215   : > { %v541_v9 = vrot.slane %v540_v8, 1 }
 0x217   : > { %v542_v10 = vadd.f32 %v541_v9, %v540_v8 }
 0x219   : > { %544 = vst.msk [vmem:[%s289_s25] sm:$0x1] %vm543_vm14, %v542_v10 }
 0x21a PF: > { %p13_p4 = scmp.ge.s32.totalorder %s1005_s28, 4   ;;  %s1191_s15 = smov %s919_s16 }
 0x21b   : > { %s1192_s16 = smov %s923_s17  ;;  %s1193_s17 = smov %s1020_s7 }
 0x21c   : > { %s1194_s18 = smov %s1005_s28  ;;  %15 = sbr.rel (!%p13_p4) target bundleno = 3 (0x3), region = 94 }
 0x221   :  { %562 = vsyncpa [#allocation3], 1 }
 0x222   :  { %564 = vsyncpa [#allocation3 + $0x1], 1 }
 0x223   :  { %565 = vsyncpa [#allocation5], 1 }

</bundles_post_ra>
